<compile_context>
chip_gen: v6e
topology: v6e:2x2x1
jax: 0.10.0
libtpu: 0.0.40
codegen_flags: <defaults>
</compile_context>

<pallas_src>
import functools

import jax
import jax.numpy as jnp
from jax import lax
from jax.experimental import pallas as pl
from jax.experimental.pallas import tpu as pltpu

# Small, self-consistent model dims.
EMBED_DIM = 32
NUM_HEADS = 4
HIDDEN_DIM = 64
HEAD_DIM = EMBED_DIM // NUM_HEADS
SEQ_LEN = 8
BATCH = 2
LN_EPS = 1e-5


def _layer_norm(x, gamma, beta):
    mean = jnp.mean(x, axis=-1, keepdims=True)
    var = jnp.mean((x - mean) ** 2, axis=-1, keepdims=True)  # biased var (PyTorch)
    return (x - mean) * lax.rsqrt(var + LN_EPS) * gamma + beta


def _transformer_block_kernel(
    x_ref,       # (L*N, E)  tokens, rows in (l, n) order (free reshape of (L, N, E))
    w_qkv_ref,   # (E, 3E)   x @ W ; Q columns already scaled by 1/sqrt(HEAD_DIM)
    b_qkv_ref,   # (1, 3E)
    w_o_ref,     # (E, E)
    b_o_ref,     # (1, E)
    g1_ref,      # (1, E)    norm1 weight
    be1_ref,     # (1, E)    norm1 bias
    w1_ref,      # (E, H)
    bf1_ref,     # (1, H)
    w2_ref,      # (H, E)
    bf2_ref,     # (1, E)
    g2_ref,      # (1, E)    norm2 weight
    be2_ref,     # (1, E)    norm2 bias
    o_ref,       # (L*N, E)
    *,
    batch,
    num_heads,
    head_dim,
):
    tokens, embed = x_ref.shape
    x = x_ref[...]  # (tokens, E) f32

    # ---- Fused QKV projection over ALL tokens (one 16-row matmul) -----------
    qkv = jnp.dot(x, w_qkv_ref[...], preferred_element_type=jnp.float32) + b_qkv_ref[...]
    q = qkv[:, 0 * embed:1 * embed]   # scale already folded into weights/bias
    k = qkv[:, 1 * embed:2 * embed]
    v = qkv[:, 2 * embed:3 * embed]

    # Block-diagonal mask packing every batch sequence into one attention:
    # flat row r = l * batch + n  ->  rows may attend iff same n (= r % batch).
    ri = lax.broadcasted_iota(jnp.int32, (tokens, tokens), 0)
    ci = lax.broadcasted_iota(jnp.int32, (tokens, tokens), 1)
    same_batch = (ri % batch) == (ci % batch)
    neg_big = jnp.float32(-1e30)

    # ---- Multi-head attention: accumulate heads straight through W_o --------
    w_o = w_o_ref[...]                                                   # (E, E)
    attn = jnp.broadcast_to(b_o_ref[...], (tokens, embed)).astype(jnp.float32)
    for h in range(num_heads):                     # static, unrolled head loop
        sl = slice(h * head_dim, (h + 1) * head_dim)
        # scores: contract the head dim of q and k directly (no materialized k.T)
        s = lax.dot_general(
            q[:, sl], k[:, sl],
            dimension_numbers=(((1,), (1,)), ((), ())),
            preferred_element_type=jnp.float32,
        )                                                                # (T, T)
        s = jnp.where(same_batch, s, neg_big)
        s = s - jnp.max(s, axis=-1, keepdims=True)
        p = jnp.exp(s)
        # softmax denominator on the EUP instead of a VALU divide
        p = p * pl.reciprocal(jnp.sum(p, axis=-1, keepdims=True), approx=True)
        ctx = jnp.dot(p, v[:, sl], preferred_element_type=jnp.float32)   # (T, D)
        # accumulate through this head's rows of W_o (no jnp.concatenate)
        attn = attn + jnp.dot(ctx, w_o[sl, :], preferred_element_type=jnp.float32)

    # dropout == identity (eval mode)
    x1 = _layer_norm(x + attn, g1_ref[...], be1_ref[...])

    # ---- FeedForward (both matmuls over all 16 rows) -------------------------
    h1 = jnp.dot(x1, w1_ref[...], preferred_element_type=jnp.float32) + bf1_ref[...]
    h1 = jnp.maximum(h1, 0.0)   # ReLU
    ff = jnp.dot(h1, w2_ref[...], preferred_element_type=jnp.float32) + bf2_ref[...]

    o_ref[...] = _layer_norm(x1 + ff, g2_ref[...], be2_ref[...])


def transformer_block_pallas(x_lne, kparams):
    """x_lne: (L, N, E) float32 — PyTorch nn.MultiheadAttention default layout."""
    L, N, E = x_lne.shape
    assert E == EMBED_DIM

    # Free, row-major-compatible reshape: no XLA transpose at the boundary.
    x_flat = x_lne.reshape(L * N, E)

    kernel = functools.partial(
        _transformer_block_kernel,
        batch=N, num_heads=NUM_HEADS, head_dim=HEAD_DIM,
    )

    # Single kernel invocation (no grid): every operand is a full-array block
    # resident in VMEM — ~50 KB total, so no tiling/pipelining is needed.
    vmem_spec = pl.BlockSpec(memory_space=pltpu.MemorySpace.VMEM)

    out_flat = pl.pallas_call(
        kernel,
        out_shape=jax.ShapeDtypeStruct((L * N, E), jnp.float32),
        in_specs=[vmem_spec] * (1 + len(kparams)),
        out_specs=vmem_spec,
    )(x_flat, *kparams)

    return out_flat.reshape(L, N, E)   # free reshape back to (L, N, E)


def init_raw_params(key):
    """PyTorch-shaped synthetic parameters (in_proj packing order = [q; k; v])."""
    ks = jax.random.split(key, 6)
    s = 0.1
    w_in = jax.random.normal(ks[0], (3 * EMBED_DIM, EMBED_DIM), jnp.float32) * s
    b_in = jax.random.normal(ks[1], (3 * EMBED_DIM,), jnp.float32) * s
    w_out = jax.random.normal(ks[2], (EMBED_DIM, EMBED_DIM), jnp.float32) * s
    b_out = jax.random.normal(ks[3], (EMBED_DIM,), jnp.float32) * s
    w1 = jax.random.normal(ks[4], (HIDDEN_DIM, EMBED_DIM), jnp.float32) * s
    b1 = jnp.zeros((HIDDEN_DIM,), jnp.float32)
    w2 = jax.random.normal(ks[5], (EMBED_DIM, HIDDEN_DIM), jnp.float32) * s
    b2 = jnp.zeros((EMBED_DIM,), jnp.float32)
    g1 = jnp.ones((EMBED_DIM,), jnp.float32)
    be1 = jnp.zeros((EMBED_DIM,), jnp.float32)
    g2 = jnp.ones((EMBED_DIM,), jnp.float32)
    be2 = jnp.zeros((EMBED_DIM,), jnp.float32)
    return (w_in, b_in, w_out, b_out, g1, be1, w1, b1, w2, b2, g2, be2)


def prepare_kernel_params(raw):
    """Kernel-ready params: transpose linears (x @ W), biases as (1, dim), and
    fold 1/sqrt(HEAD_DIM) into the Q columns of the QKV projection."""
    (w_in, b_in, w_out, b_out, g1, be1, w1, b1, w2, b2, g2, be2) = raw
    scale = 1.0 / (HEAD_DIM ** 0.5)
    w_qkv_t = w_in.T                                   # (E, 3E)
    w_qkv_t = w_qkv_t.at[:, :EMBED_DIM].multiply(scale)
    b_qkv = b_in.at[:EMBED_DIM].multiply(scale)
    return (
        w_qkv_t, b_qkv[None, :],
        w_out.T, b_out[None, :],
        g1[None, :], be1[None, :],
        w1.T, b1[None, :],
        w2.T, b2[None, :],
        g2[None, :], be2[None, :],
    )


def reference_forward(x_lne, raw):
    """Pure-JAX reference reproducing the PyTorch forward (dropout = identity)."""
    (w_in, b_in, w_out, b_out, g1, be1, w1, b1, w2, b2, g2, be2) = raw
    L, N, E = x_lne.shape
    x = jnp.transpose(x_lne, (1, 0, 2))               # (N, L, E)
    qkv = x @ w_in.T + b_in
    q, k, v = jnp.split(qkv, 3, axis=-1)

    def split_heads(t):                                # (N, L, E) -> (N, H, L, D)
        return jnp.transpose(t.reshape(N, L, NUM_HEADS, HEAD_DIM), (0, 2, 1, 3))

    qh, kh, vh = split_heads(q), split_heads(k), split_heads(v)
    s = jnp.einsum("nhld,nhmd->nhlm", qh, kh) / (HEAD_DIM ** 0.5)
    p = jax.nn.softmax(s, axis=-1)
    o = jnp.einsum("nhlm,nhmd->nhld", p, vh)
    o = jnp.transpose(o, (0, 2, 1, 3)).reshape(N, L, E)
    attn = o @ w_out.T + b_out

    def ln(t, g, b):
        m = jnp.mean(t, axis=-1, keepdims=True)
        var = jnp.mean((t - m) ** 2, axis=-1, keepdims=True)
        return (t - m) * lax.rsqrt(var + LN_EPS) * g + b

    x1 = ln(x + attn, g1, be1)
    ff = jnp.maximum(x1 @ w1.T + b1, 0.0) @ w2.T + b2
    x2 = ln(x1 + ff, g2, be2)
    return jnp.transpose(x2, (1, 0, 2))


if __name__ == "__main__":
    key = jax.random.PRNGKey(0)
    k_x, k_p = jax.random.split(key)
    # PyTorch MultiheadAttention default layout: (seq, batch, embed)
    x = jax.random.normal(k_x, (SEQ_LEN, BATCH, EMBED_DIM), jnp.float32)

    raw_params = init_raw_params(k_p)
    kernel_params = prepare_kernel_params(raw_params)

    out = jax.jit(transformer_block_pallas)(x, kernel_params)
    out = jax.block_until_ready(out)

    ref = reference_forward(x, raw_params)
    # Tolerance covers pl.reciprocal(approx=True) in the softmax denominator.
    if not jnp.allclose(out, ref, atol=5e-3, rtol=5e-3):
        max_err = float(jnp.max(jnp.abs(out - ref)))
        raise AssertionError(
            f"Pallas output mismatch vs pure-JAX reference (max abs err {max_err:.3e})")

    print("KERNEL_OK")
</pallas_src>

<mosaic_0001>
module attributes {stable_mosaic.version = 11 : i64} {
  func.func @_transformer_block_kernel(%arg0: memref<16x32xf32, #tpu.memory_space<vmem>>, %arg1: memref<32x96xf32, #tpu.memory_space<vmem>>, %arg2: memref<1x96xf32, #tpu.memory_space<vmem>>, %arg3: memref<32x32xf32, #tpu.memory_space<vmem>>, %arg4: memref<1x32xf32, #tpu.memory_space<vmem>>, %arg5: memref<1x32xf32, #tpu.memory_space<vmem>>, %arg6: memref<1x32xf32, #tpu.memory_space<vmem>>, %arg7: memref<32x64xf32, #tpu.memory_space<vmem>>, %arg8: memref<1x64xf32, #tpu.memory_space<vmem>>, %arg9: memref<64x32xf32, #tpu.memory_space<vmem>>, %arg10: memref<1x32xf32, #tpu.memory_space<vmem>>, %arg11: memref<1x32xf32, #tpu.memory_space<vmem>>, %arg12: memref<1x32xf32, #tpu.memory_space<vmem>>, %arg13: memref<16x32xf32, #tpu.memory_space<vmem>>) attributes {dimension_semantics = [], scalar_prefetch = 0 : i64, scratch_operands = 0 : i64, tpu.core_type = #tpu.core_type<tc>} {
    %c0 = arith.constant 0 : index
    %c0_0 = arith.constant 0 : index
    %0 = vector.load %arg0[%c0, %c0_0] : memref<16x32xf32, #tpu.memory_space<vmem>>, vector<16x32xf32>
    %c0_1 = arith.constant 0 : index
    %c0_2 = arith.constant 0 : index
    %1 = vector.load %arg1[%c0_1, %c0_2] : memref<32x96xf32, #tpu.memory_space<vmem>>, vector<32x96xf32>
    %cst = arith.constant dense<0.000000e+00> : vector<16x96xf32>
    %2 = tpu.matmul %0, %1, %cst {dimension_numbers = #tpu.dot_dimension_numbers<[1], [0], [0], [1], [0, 0, 1, 1], [], []>} : vector<16x32xf32>, vector<32x96xf32>, vector<16x96xf32> -> vector<16x96xf32>
    %c0_3 = arith.constant 0 : index
    %c0_4 = arith.constant 0 : index
    %3 = vector.load %arg2[%c0_3, %c0_4] : memref<1x96xf32, #tpu.memory_space<vmem>>, vector<1x96xf32>
    %4 = vector.broadcast %3 : vector<1x96xf32> to vector<16x96xf32>
    %5 = arith.addf %2, %4 : vector<16x96xf32>
    %6 = vector.extract_strided_slice %5 {offsets = [0, 0], sizes = [16, 32], strides = [1, 1]} : vector<16x96xf32> to vector<16x32xf32>
    %7 = vector.extract_strided_slice %5 {offsets = [0, 32], sizes = [16, 32], strides = [1, 1]} : vector<16x96xf32> to vector<16x32xf32>
    %8 = vector.extract_strided_slice %5 {offsets = [0, 64], sizes = [16, 32], strides = [1, 1]} : vector<16x96xf32> to vector<16x32xf32>
    %9 = tpu.iota {dimensions = array<i32: 0>} : vector<16x16xi32>
    %10 = tpu.iota {dimensions = array<i32: 1>} : vector<16x16xi32>
    %c2_i32 = arith.constant 2 : i32
    %c0_i32 = arith.constant 0 : i32
    %11 = arith.cmpi eq, %c2_i32, %c0_i32 : i32
    %c1_i32 = arith.constant 1 : i32
    %12 = arith.select %11, %c1_i32, %c2_i32 : i32
    %13 = vector.broadcast %12 : i32 to vector<16x16xi32>
    %14 = arith.remsi %9, %13 : vector<16x16xi32>
    %c0_i32_5 = arith.constant 0 : i32
    %15 = vector.broadcast %c0_i32_5 : i32 to vector<16x16xi32>
    %16 = arith.cmpi ne, %14, %15 : vector<16x16xi32>
    %c0_i32_6 = arith.constant 0 : i32
    %17 = vector.broadcast %c0_i32_6 : i32 to vector<16x16xi32>
    %18 = arith.cmpi slt, %14, %17 : vector<16x16xi32>
    %c0_i32_7 = arith.constant 0 : i32
    %19 = arith.cmpi slt, %12, %c0_i32_7 : i32
    %20 = vector.broadcast %19 : i1 to vector<16x16xi1>
    %21 = vector.broadcast %20 : vector<16x16xi1> to vector<16x16xi1>
    %22 = arith.xori %18, %21 : vector<16x16xi1>
    %23 = arith.andi %22, %16 : vector<16x16xi1>
    %24 = vector.broadcast %12 : i32 to vector<16x16xi32>
    %25 = arith.addi %14, %24 : vector<16x16xi32>
    %26 = arith.select %23, %25, %14 : vector<16x16xi1>, vector<16x16xi32>
    %c2_i32_8 = arith.constant 2 : i32
    %c0_i32_9 = arith.constant 0 : i32
    %27 = arith.cmpi eq, %c2_i32_8, %c0_i32_9 : i32
    %c1_i32_10 = arith.constant 1 : i32
    %28 = arith.select %27, %c1_i32_10, %c2_i32_8 : i32
    %29 = vector.broadcast %28 : i32 to vector<16x16xi32>
    %30 = arith.remsi %10, %29 : vector<16x16xi32>
    %c0_i32_11 = arith.constant 0 : i32
    %31 = vector.broadcast %c0_i32_11 : i32 to vector<16x16xi32>
    %32 = arith.cmpi ne, %30, %31 : vector<16x16xi32>
    %c0_i32_12 = arith.constant 0 : i32
    %33 = vector.broadcast %c0_i32_12 : i32 to vector<16x16xi32>
    %34 = arith.cmpi slt, %30, %33 : vector<16x16xi32>
    %c0_i32_13 = arith.constant 0 : i32
    %35 = arith.cmpi slt, %28, %c0_i32_13 : i32
    %36 = vector.broadcast %35 : i1 to vector<16x16xi1>
    %37 = vector.broadcast %36 : vector<16x16xi1> to vector<16x16xi1>
    %38 = arith.xori %34, %37 : vector<16x16xi1>
    %39 = arith.andi %38, %32 : vector<16x16xi1>
    %40 = vector.broadcast %28 : i32 to vector<16x16xi32>
    %41 = arith.addi %30, %40 : vector<16x16xi32>
    %42 = arith.select %39, %41, %30 : vector<16x16xi1>, vector<16x16xi32>
    %43 = arith.cmpi eq, %26, %42 : vector<16x16xi32>
    %c0_14 = arith.constant 0 : index
    %c0_15 = arith.constant 0 : index
    %44 = vector.load %arg3[%c0_14, %c0_15] : memref<32x32xf32, #tpu.memory_space<vmem>>, vector<32x32xf32>
    %c0_16 = arith.constant 0 : index
    %c0_17 = arith.constant 0 : index
    %45 = vector.load %arg4[%c0_16, %c0_17] : memref<1x32xf32, #tpu.memory_space<vmem>>, vector<1x32xf32>
    %46 = vector.shape_cast %45 : vector<1x32xf32> to vector<1x32xf32>
    %47 = vector.broadcast %46 : vector<1x32xf32> to vector<16x32xf32>
    %48 = vector.extract_strided_slice %6 {offsets = [0, 0], sizes = [16, 8], strides = [1, 1]} : vector<16x32xf32> to vector<16x8xf32>
    %49 = vector.extract_strided_slice %7 {offsets = [0, 0], sizes = [16, 8], strides = [1, 1]} : vector<16x32xf32> to vector<16x8xf32>
    %cst_18 = arith.constant dense<0.000000e+00> : vector<16x16xf32>
    %50 = tpu.matmul %48, %49, %cst_18 {dimension_numbers = #tpu.dot_dimension_numbers<[1], [1], [0], [0], [0, 0, 1, 0], [], []>} : vector<16x8xf32>, vector<16x8xf32>, vector<16x16xf32> -> vector<16x16xf32>
    %cst_19 = arith.constant -1.000000e+30 : f32
    %51 = vector.broadcast %cst_19 : f32 to vector<16x16xf32>
    %52 = arith.select %43, %50, %51 : vector<16x16xi1>, vector<16x16xf32>
    %cst_20 = arith.constant dense<0xFF800000> : vector<16xf32>
    %53 = vector.multi_reduction <maximumf>, %52, %cst_20 [1] : vector<16x16xf32> to vector<16xf32>
    %54 = vector.shape_cast %53 : vector<16xf32> to vector<16x1xf32>
    %55 = vector.broadcast %54 : vector<16x1xf32> to vector<16x16xf32>
    %56 = arith.subf %52, %55 : vector<16x16xf32>
    %57 = math.exp %56 : vector<16x16xf32>
    %cst_21 = arith.constant dense<0.000000e+00> : vector<16xf32>
    %58 = vector.multi_reduction <add>, %57, %cst_21 [1] : vector<16x16xf32> to vector<16xf32>
    %59 = vector.shape_cast %58 : vector<16xf32> to vector<16x1xf32>
    %60 = tpu.reciprocal %59 {approx = true} : vector<16x1xf32> -> vector<16x1xf32>
    %61 = vector.broadcast %60 : vector<16x1xf32> to vector<16x16xf32>
    %62 = arith.mulf %57, %61 : vector<16x16xf32>
    %63 = vector.extract_strided_slice %8 {offsets = [0, 0], sizes = [16, 8], strides = [1, 1]} : vector<16x32xf32> to vector<16x8xf32>
    %cst_22 = arith.constant dense<0.000000e+00> : vector<16x8xf32>
    %64 = tpu.matmul %62, %63, %cst_22 {dimension_numbers = #tpu.dot_dimension_numbers<[1], [0], [0], [1], [0, 0, 1, 1], [], []>} : vector<16x16xf32>, vector<16x8xf32>, vector<16x8xf32> -> vector<16x8xf32>
    %65 = vector.extract_strided_slice %44 {offsets = [0, 0], sizes = [8, 32], strides = [1, 1]} : vector<32x32xf32> to vector<8x32xf32>
    %cst_23 = arith.constant dense<0.000000e+00> : vector<16x32xf32>
    %66 = tpu.matmul %64, %65, %cst_23 {dimension_numbers = #tpu.dot_dimension_numbers<[1], [0], [0], [1], [0, 0, 1, 1], [], []>} : vector<16x8xf32>, vector<8x32xf32>, vector<16x32xf32> -> vector<16x32xf32>
    %67 = arith.addf %47, %66 : vector<16x32xf32>
    %68 = vector.extract_strided_slice %6 {offsets = [0, 8], sizes = [16, 8], strides = [1, 1]} : vector<16x32xf32> to vector<16x8xf32>
    %69 = vector.extract_strided_slice %7 {offsets = [0, 8], sizes = [16, 8], strides = [1, 1]} : vector<16x32xf32> to vector<16x8xf32>
    %cst_24 = arith.constant dense<0.000000e+00> : vector<16x16xf32>
    %70 = tpu.matmul %68, %69, %cst_24 {dimension_numbers = #tpu.dot_dimension_numbers<[1], [1], [0], [0], [0, 0, 1, 0], [], []>} : vector<16x8xf32>, vector<16x8xf32>, vector<16x16xf32> -> vector<16x16xf32>
    %cst_25 = arith.constant -1.000000e+30 : f32
    %71 = vector.broadcast %cst_25 : f32 to vector<16x16xf32>
    %72 = arith.select %43, %70, %71 : vector<16x16xi1>, vector<16x16xf32>
    %cst_26 = arith.constant dense<0xFF800000> : vector<16xf32>
    %73 = vector.multi_reduction <maximumf>, %72, %cst_26 [1] : vector<16x16xf32> to vector<16xf32>
    %74 = vector.shape_cast %73 : vector<16xf32> to vector<16x1xf32>
    %75 = vector.broadcast %74 : vector<16x1xf32> to vector<16x16xf32>
    %76 = arith.subf %72, %75 : vector<16x16xf32>
    %77 = math.exp %76 : vector<16x16xf32>
    %cst_27 = arith.constant dense<0.000000e+00> : vector<16xf32>
    %78 = vector.multi_reduction <add>, %77, %cst_27 [1] : vector<16x16xf32> to vector<16xf32>
    %79 = vector.shape_cast %78 : vector<16xf32> to vector<16x1xf32>
    %80 = tpu.reciprocal %79 {approx = true} : vector<16x1xf32> -> vector<16x1xf32>
    %81 = vector.broadcast %80 : vector<16x1xf32> to vector<16x16xf32>
    %82 = arith.mulf %77, %81 : vector<16x16xf32>
    %83 = vector.extract_strided_slice %8 {offsets = [0, 8], sizes = [16, 8], strides = [1, 1]} : vector<16x32xf32> to vector<16x8xf32>
    %cst_28 = arith.constant dense<0.000000e+00> : vector<16x8xf32>
    %84 = tpu.matmul %82, %83, %cst_28 {dimension_numbers = #tpu.dot_dimension_numbers<[1], [0], [0], [1], [0, 0, 1, 1], [], []>} : vector<16x16xf32>, vector<16x8xf32>, vector<16x8xf32> -> vector<16x8xf32>
    %85 = vector.extract_strided_slice %44 {offsets = [8, 0], sizes = [8, 32], strides = [1, 1]} : vector<32x32xf32> to vector<8x32xf32>
    %cst_29 = arith.constant dense<0.000000e+00> : vector<16x32xf32>
    %86 = tpu.matmul %84, %85, %cst_29 {dimension_numbers = #tpu.dot_dimension_numbers<[1], [0], [0], [1], [0, 0, 1, 1], [], []>} : vector<16x8xf32>, vector<8x32xf32>, vector<16x32xf32> -> vector<16x32xf32>
    %87 = arith.addf %67, %86 : vector<16x32xf32>
    %88 = vector.extract_strided_slice %6 {offsets = [0, 16], sizes = [16, 8], strides = [1, 1]} : vector<16x32xf32> to vector<16x8xf32>
    %89 = vector.extract_strided_slice %7 {offsets = [0, 16], sizes = [16, 8], strides = [1, 1]} : vector<16x32xf32> to vector<16x8xf32>
    %cst_30 = arith.constant dense<0.000000e+00> : vector<16x16xf32>
    %90 = tpu.matmul %88, %89, %cst_30 {dimension_numbers = #tpu.dot_dimension_numbers<[1], [1], [0], [0], [0, 0, 1, 0], [], []>} : vector<16x8xf32>, vector<16x8xf32>, vector<16x16xf32> -> vector<16x16xf32>
    %cst_31 = arith.constant -1.000000e+30 : f32
    %91 = vector.broadcast %cst_31 : f32 to vector<16x16xf32>
    %92 = arith.select %43, %90, %91 : vector<16x16xi1>, vector<16x16xf32>
    %cst_32 = arith.constant dense<0xFF800000> : vector<16xf32>
    %93 = vector.multi_reduction <maximumf>, %92, %cst_32 [1] : vector<16x16xf32> to vector<16xf32>
    %94 = vector.shape_cast %93 : vector<16xf32> to vector<16x1xf32>
    %95 = vector.broadcast %94 : vector<16x1xf32> to vector<16x16xf32>
    %96 = arith.subf %92, %95 : vector<16x16xf32>
    %97 = math.exp %96 : vector<16x16xf32>
    %cst_33 = arith.constant dense<0.000000e+00> : vector<16xf32>
    %98 = vector.multi_reduction <add>, %97, %cst_33 [1] : vector<16x16xf32> to vector<16xf32>
    %99 = vector.shape_cast %98 : vector<16xf32> to vector<16x1xf32>
    %100 = tpu.reciprocal %99 {approx = true} : vector<16x1xf32> -> vector<16x1xf32>
    %101 = vector.broadcast %100 : vector<16x1xf32> to vector<16x16xf32>
    %102 = arith.mulf %97, %101 : vector<16x16xf32>
    %103 = vector.extract_strided_slice %8 {offsets = [0, 16], sizes = [16, 8], strides = [1, 1]} : vector<16x32xf32> to vector<16x8xf32>
    %cst_34 = arith.constant dense<0.000000e+00> : vector<16x8xf32>
    %104 = tpu.matmul %102, %103, %cst_34 {dimension_numbers = #tpu.dot_dimension_numbers<[1], [0], [0], [1], [0, 0, 1, 1], [], []>} : vector<16x16xf32>, vector<16x8xf32>, vector<16x8xf32> -> vector<16x8xf32>
    %105 = vector.extract_strided_slice %44 {offsets = [16, 0], sizes = [8, 32], strides = [1, 1]} : vector<32x32xf32> to vector<8x32xf32>
    %cst_35 = arith.constant dense<0.000000e+00> : vector<16x32xf32>
    %106 = tpu.matmul %104, %105, %cst_35 {dimension_numbers = #tpu.dot_dimension_numbers<[1], [0], [0], [1], [0, 0, 1, 1], [], []>} : vector<16x8xf32>, vector<8x32xf32>, vector<16x32xf32> -> vector<16x32xf32>
    %107 = arith.addf %87, %106 : vector<16x32xf32>
    %108 = vector.extract_strided_slice %6 {offsets = [0, 24], sizes = [16, 8], strides = [1, 1]} : vector<16x32xf32> to vector<16x8xf32>
    %109 = vector.extract_strided_slice %7 {offsets = [0, 24], sizes = [16, 8], strides = [1, 1]} : vector<16x32xf32> to vector<16x8xf32>
    %cst_36 = arith.constant dense<0.000000e+00> : vector<16x16xf32>
    %110 = tpu.matmul %108, %109, %cst_36 {dimension_numbers = #tpu.dot_dimension_numbers<[1], [1], [0], [0], [0, 0, 1, 0], [], []>} : vector<16x8xf32>, vector<16x8xf32>, vector<16x16xf32> -> vector<16x16xf32>
    %cst_37 = arith.constant -1.000000e+30 : f32
    %111 = vector.broadcast %cst_37 : f32 to vector<16x16xf32>
    %112 = arith.select %43, %110, %111 : vector<16x16xi1>, vector<16x16xf32>
    %cst_38 = arith.constant dense<0xFF800000> : vector<16xf32>
    %113 = vector.multi_reduction <maximumf>, %112, %cst_38 [1] : vector<16x16xf32> to vector<16xf32>
    %114 = vector.shape_cast %113 : vector<16xf32> to vector<16x1xf32>
    %115 = vector.broadcast %114 : vector<16x1xf32> to vector<16x16xf32>
    %116 = arith.subf %112, %115 : vector<16x16xf32>
    %117 = math.exp %116 : vector<16x16xf32>
    %cst_39 = arith.constant dense<0.000000e+00> : vector<16xf32>
    %118 = vector.multi_reduction <add>, %117, %cst_39 [1] : vector<16x16xf32> to vector<16xf32>
    %119 = vector.shape_cast %118 : vector<16xf32> to vector<16x1xf32>
    %120 = tpu.reciprocal %119 {approx = true} : vector<16x1xf32> -> vector<16x1xf32>
    %121 = vector.broadcast %120 : vector<16x1xf32> to vector<16x16xf32>
    %122 = arith.mulf %117, %121 : vector<16x16xf32>
    %123 = vector.extract_strided_slice %8 {offsets = [0, 24], sizes = [16, 8], strides = [1, 1]} : vector<16x32xf32> to vector<16x8xf32>
    %cst_40 = arith.constant dense<0.000000e+00> : vector<16x8xf32>
    %124 = tpu.matmul %122, %123, %cst_40 {dimension_numbers = #tpu.dot_dimension_numbers<[1], [0], [0], [1], [0, 0, 1, 1], [], []>} : vector<16x16xf32>, vector<16x8xf32>, vector<16x8xf32> -> vector<16x8xf32>
    %125 = vector.extract_strided_slice %44 {offsets = [24, 0], sizes = [8, 32], strides = [1, 1]} : vector<32x32xf32> to vector<8x32xf32>
    %cst_41 = arith.constant dense<0.000000e+00> : vector<16x32xf32>
    %126 = tpu.matmul %124, %125, %cst_41 {dimension_numbers = #tpu.dot_dimension_numbers<[1], [0], [0], [1], [0, 0, 1, 1], [], []>} : vector<16x8xf32>, vector<8x32xf32>, vector<16x32xf32> -> vector<16x32xf32>
    %127 = arith.addf %107, %126 : vector<16x32xf32>
    %128 = arith.addf %0, %127 : vector<16x32xf32>
    %c0_42 = arith.constant 0 : index
    %c0_43 = arith.constant 0 : index
    %129 = vector.load %arg5[%c0_42, %c0_43] : memref<1x32xf32, #tpu.memory_space<vmem>>, vector<1x32xf32>
    %c0_44 = arith.constant 0 : index
    %c0_45 = arith.constant 0 : index
    %130 = vector.load %arg6[%c0_44, %c0_45] : memref<1x32xf32, #tpu.memory_space<vmem>>, vector<1x32xf32>
    %cst_46 = arith.constant dense<0.000000e+00> : vector<16xf32>
    %131 = vector.multi_reduction <add>, %128, %cst_46 [1] : vector<16x32xf32> to vector<16xf32>
    %132 = vector.shape_cast %131 : vector<16xf32> to vector<16x1xf32>
    %cst_47 = arith.constant 3.200000e+01 : f32
    %133 = vector.broadcast %cst_47 : f32 to vector<16x1xf32>
    %134 = arith.divf %132, %133 : vector<16x1xf32>
    %135 = vector.broadcast %134 : vector<16x1xf32> to vector<16x32xf32>
    %136 = arith.subf %128, %135 : vector<16x32xf32>
    %137 = arith.mulf %136, %136 : vector<16x32xf32>
    %cst_48 = arith.constant dense<0.000000e+00> : vector<16xf32>
    %138 = vector.multi_reduction <add>, %137, %cst_48 [1] : vector<16x32xf32> to vector<16xf32>
    %139 = vector.shape_cast %138 : vector<16xf32> to vector<16x1xf32>
    %cst_49 = arith.constant 3.200000e+01 : f32
    %140 = vector.broadcast %cst_49 : f32 to vector<16x1xf32>
    %141 = arith.divf %139, %140 : vector<16x1xf32>
    %142 = vector.broadcast %134 : vector<16x1xf32> to vector<16x32xf32>
    %143 = arith.subf %128, %142 : vector<16x32xf32>
    %cst_50 = arith.constant 9.99999974E-6 : f32
    %144 = vector.broadcast %cst_50 : f32 to vector<16x1xf32>
    %145 = arith.addf %141, %144 : vector<16x1xf32>
    %146 = math.rsqrt %145 : vector<16x1xf32>
    %147 = vector.broadcast %146 : vector<16x1xf32> to vector<16x32xf32>
    %148 = arith.mulf %143, %147 : vector<16x32xf32>
    %149 = vector.broadcast %129 : vector<1x32xf32> to vector<16x32xf32>
    %150 = arith.mulf %148, %149 : vector<16x32xf32>
    %151 = vector.broadcast %130 : vector<1x32xf32> to vector<16x32xf32>
    %152 = arith.addf %150, %151 : vector<16x32xf32>
    %c0_51 = arith.constant 0 : index
    %c0_52 = arith.constant 0 : index
    %153 = vector.load %arg7[%c0_51, %c0_52] : memref<32x64xf32, #tpu.memory_space<vmem>>, vector<32x64xf32>
    %cst_53 = arith.constant dense<0.000000e+00> : vector<16x64xf32>
    %154 = tpu.matmul %152, %153, %cst_53 {dimension_numbers = #tpu.dot_dimension_numbers<[1], [0], [0], [1], [0, 0, 1, 1], [], []>} : vector<16x32xf32>, vector<32x64xf32>, vector<16x64xf32> -> vector<16x64xf32>
    %c0_54 = arith.constant 0 : index
    %c0_55 = arith.constant 0 : index
    %155 = vector.load %arg8[%c0_54, %c0_55] : memref<1x64xf32, #tpu.memory_space<vmem>>, vector<1x64xf32>
    %156 = vector.broadcast %155 : vector<1x64xf32> to vector<16x64xf32>
    %157 = arith.addf %154, %156 : vector<16x64xf32>
    %cst_56 = arith.constant 0.000000e+00 : f32
    %158 = vector.broadcast %cst_56 : f32 to vector<16x64xf32>
    %159 = arith.maximumf %157, %158 : vector<16x64xf32>
    %c0_57 = arith.constant 0 : index
    %c0_58 = arith.constant 0 : index
    %160 = vector.load %arg9[%c0_57, %c0_58] : memref<64x32xf32, #tpu.memory_space<vmem>>, vector<64x32xf32>
    %cst_59 = arith.constant dense<0.000000e+00> : vector<16x32xf32>
    %161 = tpu.matmul %159, %160, %cst_59 {dimension_numbers = #tpu.dot_dimension_numbers<[1], [0], [0], [1], [0, 0, 1, 1], [], []>} : vector<16x64xf32>, vector<64x32xf32>, vector<16x32xf32> -> vector<16x32xf32>
    %c0_60 = arith.constant 0 : index
    %c0_61 = arith.constant 0 : index
    %162 = vector.load %arg10[%c0_60, %c0_61] : memref<1x32xf32, #tpu.memory_space<vmem>>, vector<1x32xf32>
    %163 = vector.broadcast %162 : vector<1x32xf32> to vector<16x32xf32>
    %164 = arith.addf %161, %163 : vector<16x32xf32>
    %165 = arith.addf %152, %164 : vector<16x32xf32>
    %c0_62 = arith.constant 0 : index
    %c0_63 = arith.constant 0 : index
    %166 = vector.load %arg11[%c0_62, %c0_63] : memref<1x32xf32, #tpu.memory_space<vmem>>, vector<1x32xf32>
    %c0_64 = arith.constant 0 : index
    %c0_65 = arith.constant 0 : index
    %167 = vector.load %arg12[%c0_64, %c0_65] : memref<1x32xf32, #tpu.memory_space<vmem>>, vector<1x32xf32>
    %cst_66 = arith.constant dense<0.000000e+00> : vector<16xf32>
    %168 = vector.multi_reduction <add>, %165, %cst_66 [1] : vector<16x32xf32> to vector<16xf32>
    %169 = vector.shape_cast %168 : vector<16xf32> to vector<16x1xf32>
    %cst_67 = arith.constant 3.200000e+01 : f32
    %170 = vector.broadcast %cst_67 : f32 to vector<16x1xf32>
    %171 = arith.divf %169, %170 : vector<16x1xf32>
    %172 = vector.broadcast %171 : vector<16x1xf32> to vector<16x32xf32>
    %173 = arith.subf %165, %172 : vector<16x32xf32>
    %174 = arith.mulf %173, %173 : vector<16x32xf32>
    %cst_68 = arith.constant dense<0.000000e+00> : vector<16xf32>
    %175 = vector.multi_reduction <add>, %174, %cst_68 [1] : vector<16x32xf32> to vector<16xf32>
    %176 = vector.shape_cast %175 : vector<16xf32> to vector<16x1xf32>
    %cst_69 = arith.constant 3.200000e+01 : f32
    %177 = vector.broadcast %cst_69 : f32 to vector<16x1xf32>
    %178 = arith.divf %176, %177 : vector<16x1xf32>
    %179 = vector.broadcast %171 : vector<16x1xf32> to vector<16x32xf32>
    %180 = arith.subf %165, %179 : vector<16x32xf32>
    %cst_70 = arith.constant 9.99999974E-6 : f32
    %181 = vector.broadcast %cst_70 : f32 to vector<16x1xf32>
    %182 = arith.addf %178, %181 : vector<16x1xf32>
    %183 = math.rsqrt %182 : vector<16x1xf32>
    %184 = vector.broadcast %183 : vector<16x1xf32> to vector<16x32xf32>
    %185 = arith.mulf %180, %184 : vector<16x32xf32>
    %186 = vector.broadcast %166 : vector<1x32xf32> to vector<16x32xf32>
    %187 = arith.mulf %185, %186 : vector<16x32xf32>
    %188 = vector.broadcast %167 : vector<1x32xf32> to vector<16x32xf32>
    %189 = arith.addf %187, %188 : vector<16x32xf32>
    %c0_71 = arith.constant 0 : index
    %c0_72 = arith.constant 0 : index
    %190 = vector.load %arg13[%c0_71, %c0_72] : memref<16x32xf32, #tpu.memory_space<vmem>>, vector<16x32xf32>
    tpu.vector_store %arg13[%c0_71, %c0_72], %189 {strides = array<i32>} : memref<16x32xf32, #tpu.memory_space<vmem>>, vector<16x32xf32>,
    return
  }
}

</mosaic_0001>

<bundles_post_ra>
// kernel: transformer_block_pallas.1
= control target key start
LH: loop header
LB: loop body
LE: loop exit
PB: predicated region body
PF: predicated region fallthrough
CT: control target
= control target key end

     0   :  { %18 = vsyncpa [#allocation3], 0  ;;  %s2302_s0 = inlined_call_operand.hbm [shape: f32[16,32], index: 0, kind: input, shape index: {}]   ;;  %s2303_s1 = inlined_call_operand.vmem [shape: f32[32,96], index: 1, kind: input, shape index: {}]   ;;  %s2304_s2 = inlined_call_operand.vmem [shape: f32[1,96], index: 2, kind: input, shape index: {}]   ;;  %s2305_s3 = inlined_call_operand.vmem [shape: f32[32,32], index: 3, kind: input, shape index: {}]   ;;  %s2306_s4 = inlined_call_operand.vmem [shape: f32[1,32], index: 4, kind: input, shape index: {}]   ;;  %s2307_s5 = inlined_call_operand.vmem [shape: f32[1,32], index: 5, kind: input, shape index: {}]   ;;  %s2308_s6 = inlined_call_operand.vmem [shape: f32[1,32], index: 6, kind: input, shape index: {}]   ;;  %s2309_s7 = inlined_call_operand.vmem [shape: f32[32,64], index: 7, kind: input, shape index: {}]   ;;  %s2310_s8 = inlined_call_operand.vmem [shape: f32[1,64], index: 8, kind: input, shape index: {}]   ;;  %s2311_s9 = inlined_call_operand.vmem [shape: f32[64,32], index: 9, kind: input, shape index: {}]   ;;  %s2312_s10 = inlined_call_operand.vmem [shape: f32[1,32], index: 10, kind: input, shape index: {}]   ;;  %s2313_s11 = inlined_call_operand.vmem [shape: f32[1,32], index: 11, kind: input, shape index: {}]   ;;  %s2314_s12 = inlined_call_operand.vmem [shape: f32[1,32], index: 12, kind: input, shape index: {}]   ;;  %s2315_s13 = inlined_call_operand.hbm [shape: f32[16,32], index: 13, kind: output, shape index: {}]  }
   0x1   :  { %19 = vsyncpa [#allocation4], 0  ;;  %s1979_s25 = smov [#allocation2]  }
   0x2   :  { %s25_s26 = sshll.u32 %s1979_s25, 4  ;;  %s26_s26 = int_to_ptr.vmem [resolvable:$true] %s25_s26 }
   0x3   :  { %s1943_s27 = scalar_lea.vmem %s26_s26, 256  ;;  %p1948_p1 = scmp.lt.s32.totalorder %s26_s26, %s26_s26 }
   0x4   :  { %p1944_p0 = scmp.ne.s32.totalorder %s26_s26, %s1943_s27  ;;  %p1949_p2 = scmp.lt.s32.totalorder %s1943_s27, %s1943_s27 }
   0x6   :  { %p1950_p3 = por %p1949_p2, %p1948_p1 }
   0x8   :  { %p1951_p4 = pnand %p1950_p3, %p1944_p0 }
   0xa   :  { %1954 = shalt.err (!%p1951_p4)
}
   0xb   :  { %s1980_s28 = smov 128   ;;  %s1981_s29 = smov 8  }
   0xc   :  { %31 = dma.hbm_to_vmem [thread:$0]  %s2302_s0, 256, %s26_s26, [#allocation3], %s1980_s28, %s1980_s28, %s1981_s29  }
   0xd   :  { %1975 = dma.done.wait [#allocation3], 256  }
   0xe   :  { %1976 = vsyncadd [#allocation3], 4294967040  ;;  %vm72_vm0 = vcmask 261120   ;;  %v64_v0 = vld [vmem:[%s2303_s1 + $0x18] sm:$0xff]  ;;  %v63_v1 = vld [vmem:[%s2303_s1 + $0x10] sm:$0xff]  ;;  %vm214_vm1 = vcmask 64512   ;;  %v154_v13 = vlaneseq }
   0xf   :  { %1763 = vmatprep.subr.mxu0 %v64_v0  ;;  %v2076_v2 = vld [vmem:[#allocation2] sm:$0xff]  ;;  %v62_v3 = vld [vmem:[%s2303_s1 + $0x8] sm:$0xff]  ;;  %vm300_vm4 = vcmask 130048   ;;  %s1984_s24 = smov 120   ;;  %s1985_s25 = smov 88   ;;  %vm1504_vm5 = vcmask 523264  }
  0x10   :  { %1764 = vmatpush3.msra.mxu0 %v64_v0  ;;  %1771 = vmatprep.mubr.msk.f32.mxu0 %vm72_vm0, %v2076_v2  ;;  %v61_v4 = vld [vmem:[%s2303_s1] sm:$0xff]  ;;  %v2086_v5 = vld [vmem:[#allocation2 + $0x8] sm:$0xff]  ;;  %s1982_s1 = smov 96   ;;  %v155_v14 = vshrl.u32 %v154_v13, 7  ;;  %v158_v16 = vand.u32 127, %v154_v13  ;;  %s1986_s26 = smov 80  }
  0x11   :  { %1765 = vmatprep.subr.mxu0 %v63_v1  ;;  %v1651_v6 = vld [vmem:[%s2304_s2] ss:$0 sm:$0xff]  ;;  %s1983_s2 = smov 64   ;;  %s1987_s27 = smov 112  }
  0x12   :  { %1766 = vmatpush3.msra.mxu0 %v63_v1  ;;  %v156_v15 = vadd.s32 8, %v155_v14  ;;  %v163_v17 = vand.u32 1, %v155_v14  ;;  %v187_v19 = vand.u32 1, %v158_v16  ;;  %v197_v42 = vld [vmem:[%s2305_s3] sm:$0xff]  ;;  %s1988_s15 = smov 56   ;;  %s1989_s16 = smov 72  }
  0x13   :  { %1767 = vmatprep.subr.mxu0 %v62_v3  ;;  %s1990_s17 = smov 104   ;;  %s1991_s18 = smov 48  }
  0x14   :  { %1768 = vmatpush3.msra.mxu0 %v62_v3  ;;  %v170_v18 = vand.u32 1, %v156_v15  ;;  %vm2107_vm2 = vcmp.eq.s32.totalorder %v163_v17, %v187_v19  ;;  %s1992_s22 = smov 40  }
  0x15   :  { %1769 = vmatprep.subr.mxu0 %v61_v4 }
  0x16   :  { %1770 = vmatpush3.msra.mxu0 %v61_v4  ;;  %vm2111_vm3 = vcmp.eq.s32.totalorder %v170_v18, %v187_v19 }
  0x17   :  { %1772 = vmatmul.mubr.msk.f32.vlgmr.msra.gmra.mxu0 %vm72_vm0, %v2086_v5 }
  0xd7   :  { %v1773_v7 = vpop.f32.mrf.mxu0 }
  0xd8   :  { %v2093_v8 = vadd.f32 %v1773_v7, %v1651_v6 }
  0xd9   :  { %v145_v9 = vpop.f32.mrf.mxu0 }
  0xda   :  { %v2095_v10 = vadd.f32 %v1651_v6, %v145_v9  ;;  %212 = vrot.lane.b32.xlu0 %v2093_v8, %s1982_s1 }
  0xdc   :  { %1778 = vmatprep.mubr.msk.f32.mxu1 %vm214_vm1, %v2095_v10 }
  0xde   :  { %210 = vrot.lane.b32.xlu0 %v2095_v10, %s1982_s1 }
 0x14c   :  { %v213_v11 = vpop.permute.xlu0 %212 }
 0x14d   :  { %1774 = vmatprep.subr.msk.mxu1 %vm214_vm1, %v213_v11 }
 0x14e   :  { %1775 = vmatpush3.xpose.msk.msra.mxu1 %vm214_vm1, %v213_v11 }
 0x150   :  { %v211_v12 = vpop.permute.xlu0 %210 }
 0x151   :  { %1776 = vmatprep.subr.msk.mxu1 %vm214_vm1, %v211_v12 }
 0x152   :  { %1777 = vmatpush3.xpose.msk.msra.mxu1 %vm214_vm1, %v211_v12 }
 0x155   :  { %1779 = vmatmul.mubr.msk.f32.vlgmr.msra.gmra.mxu1 %vm214_vm1, %v2093_v8 }
 0x215   :  { %v1780_v20 = vpop.f32.mrf.mxu1 }
 0x216   :  { %v299_v26 = vsel %vm2111_vm3, %v1780_v20, -1e+30 }
 0x217   :  { %v289_v23 = vpop.f32.mrf.mxu1  ;;  %v304_v27 = vsel %vm300_vm4, %v299_v26, -inf }
 0x218   :  { %v298_v24 = vsel %vm2107_vm2, %v289_v23, -1e+30 }
 0x219   :  { %v301_v25 = vsel %vm300_vm4, %v298_v24, -inf }
 0x21a   :  { %302 = vmax.xlane.f32.xlu1 %v301_v25 }
 0x21e   :  { %305 = vmax.xlane.f32.xlu1 %v304_v27 }
 0x2a3   :  { %v303_v28 = vpop.xlane.xlu1 %302 }
 0x2a4   :  { %v307_v29 = vsub.f32 %v298_v24, %v303_v28 }
 0x2a6   :  { %v309_v30 = vmul.f32 1.442695, %v307_v29 }
 0x2a7   :  { %v306_v31 = vpop.xlane.xlu1 %305 }
 0x2a8   :  { %1895 = vpow2.f32 %v309_v30  ;;  %v308_v32 = vsub.f32 %v299_v26, %v306_v31 }
 0x2aa   :  { %v311_v33 = vmul.f32 1.442695, %v308_v32 }
 0x2ac   :  { %1897 = vpow2.f32 %v311_v33 }
 0x2b5   :  { %v1896_v34 = vpop.eup %1895 }
 0x2b6   :  { %v313_v35 = vsel %vm300_vm4, %v1896_v34, 0.0 }
 0x2b7   :  { %314 = vadd.xlane.f32.xlu0 %v313_v35  ;;  %v198_v35 = vld [vmem:[%s2305_s3 + $0x8] sm:$0xff] }
 0x2b9   :  { %v1898_v36 = vpop.eup %1897 }
 0x2ba   :  { %v316_v37 = vsel %vm300_vm4, %v1898_v36, 0.0 }
 0x2bb   :  { %317 = vadd.xlane.f32.xlu1 %v316_v37 }
 0x2cc   :  { %325 = vrot.lane.b32.xlu1 %v2093_v8, %s1983_s2 }
 0x2cd   :  { %493 = vrot.lane.b32.xlu0 %v2095_v10, %s1984_s24 }
 0x2d0   :  { %323 = vrot.lane.b32.xlu1 %v2095_v10, %s1983_s2 }
 0x2d4   :  { %499 = vrot.lane.b32.xlu1 %v2093_v8, %s1985_s25 }
 0x2d8   :  { %497 = vrot.lane.b32.xlu1 %v2095_v10, %s1985_s25 }
 0x2dc   :  { %495 = vrot.lane.b32.xlu1 %v2093_v8, %s1984_s24 }
 0x2e0   :  { %784 = vrot.lane.b32.xlu1 %v2093_v8, %s1986_s26 }
 0x2e4   :  { %782 = vrot.lane.b32.xlu1 %v2095_v10, %s1986_s26 }
 0x2e8   :  { %778 = vrot.lane.b32.xlu1 %v2095_v10, %s1987_s27 }
 0x2ec   :  { %780 = vrot.lane.b32.xlu1 %v2093_v8, %s1987_s27 }
 0x340   :  { %v315_v38 = vpop.xlane.xlu0 %314 }
 0x341   :  { %1899 = vrcp.f32 %v315_v38 }
 0x344   :  { %v318_v39 = vpop.xlane.xlu1 %317  ;;  %v494_v53 = vpop.permute.xlu0 %493 }
 0x345   :  { %1901 = vrcp.f32 %v318_v39 }
 0x348   :  { %v326_v40 = vpop.permute.xlu1 %325 }
 0x349   :  { %1781 = vmatprep.subr.mxu0 %v326_v40 }
 0x34a   :  { %1782 = vmatpush3.msra.mxu0 %v326_v40 }
 0x34c   :  { %v324_v41 = vpop.permute.xlu1 %323 }
 0x34d   :  { %1783 = vmatprep.subr.mxu0 %v324_v41 }
 0x34e   :  { %v1900_v43 = vpop.eup %1899  ;;  %1784 = vmatpush3.msra.mxu0 %v324_v41 }
 0x34f   :  { %v321_v44 = vmul.f32 %v1900_v43, %v1896_v34  ;;  %1788 = vmatprep.subr.mxu0 %v197_v42 }
 0x350   :  { %v500_v47 = vpop.permute.xlu1 %499 }
 0x351   :  { %1785 = vmatprep.mubr.msk.f32.mxu0 %vm300_vm4, %v321_v44 }
 0x352   :  { %v1902_v45 = vpop.eup %1901 }
 0x353   :  { %v322_v46 = vmul.f32 %v1902_v45, %v1898_v36 }
 0x354   :  { %v498_v48 = vpop.permute.xlu1 %497 }
 0x355   :  { %1786 = vmatmul.mubr.msk.f32.vlgmr.msra.gmra.mxu0 %vm300_vm4, %v322_v46 }
 0x356   :  { %1789 = vmatpush3.msra.mxu0 %v197_v42 }
 0x357   :  { %1793 = vmatprep.subr.msk.mxu0 %vm214_vm1, %v500_v47 }
 0x358   :  { %v496_v49 = vpop.permute.xlu1 %495 }
 0x35c   :  { %v785_v50 = vpop.permute.xlu1 %784 }
 0x360   :  { %v783_v54 = vpop.permute.xlu1 %782 }
 0x364   :  { %v779_v55 = vpop.permute.xlu1 %778 }
 0x368   :  { %v781_v56 = vpop.permute.xlu1 %780 }
 0x415   :  { %v1787_v51 = vpop.f32.mrf.mxu0 }
 0x417   :  { %v401_v52 = vpop.f32.mrf.mxu0 }
 0x418   :  { %1790 = vmatprep.mubr.msk.f32.mxu0 %vm214_vm1, %v401_v52 }
 0x419   :  { %1791 = vmatmul.mubr.msk.f32.vlgmr.msra.gmra.mxu0 %vm214_vm1, %v1787_v51 }
 0x41a   :  { %1794 = vmatpush3.xpose.msk.msra.mxu0 %vm214_vm1, %v500_v47  ;;  %1797 = vmatprep.mubr.msk.f32.mxu0 %vm214_vm1, %v494_v53 }
 0x41b   :  { %1795 = vmatprep.subr.msk.mxu0 %vm214_vm1, %v498_v48 }
 0x41e   :  { %1796 = vmatpush3.xpose.msk.msra.mxu0 %vm214_vm1, %v498_v48 }
 0x41f   :  { %1812 = vmatprep.subr.msk.mxu0 %vm214_vm1, %v785_v50 }
 0x421   :  { %1798 = vmatmul.mubr.msk.f32.vlgmr.msra.gmra.mxu0 %vm214_vm1, %v496_v49 }
 0x422   :  { %1813 = vmatpush3.xpose.msk.msra.mxu0 %vm214_vm1, %v785_v50  ;;  %1816 = vmatprep.mubr.msk.f32.mxu0 %vm214_vm1, %v779_v55 }
 0x423   :  { %1814 = vmatprep.subr.msk.mxu0 %vm214_vm1, %v783_v54 }
 0x426   :  { %1815 = vmatpush3.xpose.msk.msra.mxu0 %vm214_vm1, %v783_v54 }
 0x429   :  { %1817 = vmatmul.mubr.msk.f32.vlgmr.msra.gmra.mxu0 %vm214_vm1, %v781_v56 }
 0x4d9   :  { %v2152_v57 = vpop.f32.mrf.mxu0 }
 0x4db   :  { %v2154_v58 = vpop.f32.mrf.mxu0 }
 0x4e1   :  { %v1799_v59 = vpop.f32.mrf.mxu0 }
 0x4e2   :  { %v585_v60 = vsel %vm2111_vm3, %v1799_v59, -1e+30 }
 0x4e3   :  { %v575_v61 = vpop.f32.mrf.mxu0  ;;  %v589_v62 = vsel %vm300_vm4, %v585_v60, -inf }
 0x4e4   :  { %v584_v63 = vsel %vm2107_vm2, %v575_v61, -1e+30  ;;  %590 = vmax.xlane.f32.xlu1 %v589_v62  ;;  %v199_v62 = vld [vmem:[%s2305_s3 + $0x10] sm:$0xff] }
 0x4e5   :  { %v586_v0 = vsel %vm300_vm4, %v584_v63, -inf }
 0x4e6   :  { %587 = vmax.xlane.f32.xlu0 %v586_v0 }
 0x4e9   :  { %v1818_v1 = vpop.f32.mrf.mxu0 }
 0x4ea   :  { %v870_v3 = vsel %vm2111_vm3, %v1818_v1, -1e+30 }
 0x4eb   :  { %v874_v4 = vsel %vm300_vm4, %v870_v3, -inf  ;;  %v860_v27 = vpop.f32.mrf.mxu0 }
 0x4ec   :  { %v869_v28 = vsel %vm2107_vm2, %v860_v27, -1e+30 }
 0x4ed   :  { %v871_v29 = vsel %vm300_vm4, %v869_v28, -inf }
 0x4f5   :  { %610 = vrot.lane.b32.xlu1 %v2093_v8, %s1988_s15 }
 0x4f9   :  { %1069 = vrot.lane.b32.xlu1 %v2093_v8, %s1989_s16 }
 0x4fd   :  { %1067 = vrot.lane.b32.xlu1 %v2095_v10, %s1989_s16 }
 0x501   :  { %1065 = vrot.lane.b32.xlu1 %v2093_v8, %s1990_s17 }
 0x525   :  { %875 = vmax.xlane.f32.xlu1 %v874_v4 }
 0x536   :  { %895 = vrot.lane.b32.xlu1 %v2093_v8, %s1991_s18 }
 0x56d   :  { %v591_v6 = vpop.xlane.xlu1 %590 }
 0x56e   :  { %v593_v7 = vsub.f32 %v585_v60, %v591_v6 }
 0x56f   :  { %v588_v9 = vpop.xlane.xlu0 %587 }
 0x570   :  { %v596_v11 = vmul.f32 1.442695, %v593_v7  ;;  %v592_v12 = vsub.f32 %v584_v63, %v588_v9 }
 0x571   :  { %v611_v13 = vpop.permute.xlu1 %610 }
 0x572   :  { %1903 = vpow2.f32 %v596_v11  ;;  %v594_v14 = vmul.f32 1.442695, %v592_v12  ;;  %1800 = vmatprep.subr.mxu1 %v611_v13 }
 0x573   :  { %1801 = vmatpush3.msra.mxu1 %v611_v13  ;;  %v1654_v13 = vld [vmem:[%s2306_s4] ss:$0 sm:$0xff] }
 0x574   :  { %1905 = vpow2.f32 %v594_v14  ;;  %v492_v14 = vadd.f32 %v2152_v57, %v1654_v13  ;;  %v200_v57 = vld [vmem:[%s2305_s3 + $0x18] sm:$0xff] }
 0x575   :  { %v1070_v15 = vpop.permute.xlu1 %1069 }
 0x576   :  { %1831 = vmatprep.subr.msk.mxu0 %vm214_vm1, %v1070_v15 }
 0x577   :  { %1832 = vmatpush3.xpose.msk.msra.mxu0 %vm214_vm1, %v1070_v15 }
 0x579   :  { %v1068_v16 = vpop.permute.xlu1 %1067 }
 0x57a   :  { %1833 = vmatprep.subr.msk.mxu0 %vm214_vm1, %v1068_v16 }
 0x57b   :  { %1834 = vmatpush3.xpose.msk.msra.mxu0 %vm214_vm1, %v1068_v16  ;;  %v491_v16 = vadd.f32 %v1654_v13, %v2154_v58 }
 0x57d   :  { %v1066_v23 = vpop.permute.xlu1 %1065 }
 0x57f   :  { %v1904_v17 = vpop.eup %1903 }
 0x580   :  { %v601_v18 = vsel %vm300_vm4, %v1904_v17, 0.0 }
 0x581   :  { %v1906_v19 = vpop.eup %1905  ;;  %602 = vadd.xlane.f32.xlu0 %v601_v18 }
 0x582   :  { %v598_v20 = vsel %vm300_vm4, %v1906_v19, 0.0 }
 0x585   :  { %599 = vadd.xlane.f32.xlu0 %v598_v20 }
 0x59b   :  { %608 = vrot.lane.b32.xlu0 %v2095_v10, %s1988_s15 }
 0x59f   :  { %1063 = vrot.lane.b32.xlu0 %v2095_v10, %s1990_s17 }
 0x5ae   :  { %v876_v24 = vpop.xlane.xlu1 %875 }
 0x5af   :  { %v878_v25 = vsub.f32 %v870_v3, %v876_v24 }
 0x5b1   :  { %v881_v26 = vmul.f32 1.442695, %v878_v25 }
 0x5b2   :  { %v896_v41 = vpop.permute.xlu1 %895 }
 0x5b3   :  { %1907 = vpow2.f32 %v881_v26 }
 0x5be   :  { %872 = vmax.xlane.f32.xlu0 %v871_v29 }
 0x5c0   :  { %v1908_v30 = vpop.eup %1907 }
 0x5c1   :  { %v886_v31 = vsel %vm300_vm4, %v1908_v30, 0.0 }
 0x5c2   :  { %887 = vadd.xlane.f32.xlu0 %v886_v31 }
 0x60a   :  { %v603_v32 = vpop.xlane.xlu0 %602 }
 0x60b   :  { %1909 = vrcp.f32 %v603_v32 }
 0x60e   :  { %v600_v33 = vpop.xlane.xlu0 %599 }
 0x60f   :  { %1911 = vrcp.f32 %v600_v33 }
 0x612   :  { %v609_v34 = vpop.permute.xlu0 %608 }
 0x613   :  { %1802 = vmatprep.subr.mxu1 %v609_v34 }
 0x614   :  { %1803 = vmatpush3.msra.mxu1 %v609_v34 }
 0x615   :  { %1807 = vmatprep.subr.mxu1 %v198_v35 }
 0x616   :  { %v1064_v36 = vpop.permute.xlu0 %1063 }
 0x617   :  { %1835 = vmatprep.mubr.msk.f32.mxu0 %vm214_vm1, %v1064_v36 }
 0x618   :  { %1836 = vmatmul.mubr.msk.f32.vlgmr.msra.gmra.mxu0 %vm214_vm1, %v1066_v23  ;;  %v1910_v37 = vpop.eup %1909 }
 0x619   :  { %v607_v40 = vmul.f32 %v1910_v37, %v1904_v17 }
 0x61c   :  { %v1912_v38 = vpop.eup %1911 }
 0x61d   :  { %v606_v39 = vmul.f32 %v1912_v38, %v1906_v19 }
 0x61f   :  { %1804 = vmatprep.mubr.msk.f32.mxu1 %vm300_vm4, %v606_v39 }
 0x620   :  { %1805 = vmatmul.mubr.msk.f32.vlgmr.msra.gmra.mxu1 %vm300_vm4, %v607_v40 }
 0x621   :  { %1808 = vmatpush3.msra.mxu1 %v198_v35 }
 0x622   :  { %1819 = vmatprep.subr.mxu1 %v896_v41 }
 0x647   :  { %v873_v42 = vpop.xlane.xlu0 %872 }
 0x648   :  { %v877_v43 = vsub.f32 %v869_v28, %v873_v42 }
 0x64a   :  { %v879_v44 = vmul.f32 1.442695, %v877_v43 }
 0x64b   :  { %v888_v53 = vpop.xlane.xlu0 %887 }
 0x64c   :  { %1913 = vpow2.f32 %v879_v44 }
 0x64d   :  { %1915 = vrcp.f32 %v888_v53  ;;  %v1396_v53 = vld [vmem:[%s2309_s7 + $0x8] sm:$0xff] }
 0x659   :  { %v1914_v45 = vpop.eup %1913 }
 0x65a   :  { %v883_v46 = vsel %vm300_vm4, %v1914_v45, 0.0  ;;  %v1916_v21 = vpop.eup %1915 }
 0x65b   :  { %884 = vadd.xlane.f32.xlu0 %v883_v46  ;;  %v892_v61 = vmul.f32 %v1916_v21, %v1908_v30  ;;  %v1493_v21 = vld [vmem:[%s2311_s9 + $0x20] sm:$0xff] }
 0x671   :  { %893 = vrot.lane.b32.xlu0 %v2095_v10, %s1991_s18  ;;  %s1993_s18 = smov [#allocation5]  }
 0x672   :  { %s1639_s19 = sshll.u32 %s1993_s18, 4  ;;  %s1640_s19 = int_to_ptr.vmem [resolvable:$true] %s1639_s19 }
 0x673   :  { %s1955_s20 = scalar_lea.vmem %s1640_s19, 256  ;;  %p1960_p6 = scmp.lt.s32.totalorder %s1640_s19, %s1640_s19 }
 0x674   :  { %p1956_p5 = scmp.ne.s32.totalorder %s1640_s19, %s1955_s20  ;;  %p1961_p7 = scmp.lt.s32.totalorder %s1955_s20, %s1955_s20 }
 0x676   :  { %p1962_p8 = por %p1961_p7, %p1960_p6 }
 0x678   :  { %p1963_p9 = pnand %p1962_p8, %p1956_p5 }
 0x6d8   :  { %v1837_v47 = vpop.f32.mrf.mxu0 }
 0x6d9   :  { %v1155_v48 = vsel %vm2111_vm3, %v1837_v47, -1e+30 }
 0x6da   :  { %v1145_v49 = vpop.f32.mrf.mxu0  ;;  %v1159_v50 = vsel %vm300_vm4, %v1155_v48, -inf }
 0x6db   :  { %v1154_v51 = vsel %vm2107_vm2, %v1145_v49, -1e+30  ;;  %1160 = vmax.xlane.f32.xlu0 %v1159_v50 }
 0x6dc   :  { %v1156_v52 = vsel %vm300_vm4, %v1154_v51, -inf }
 0x6dd   :  { %1157 = vmax.xlane.f32.xlu1 %v1156_v52  ;;  %v1397_v52 = vld [vmem:[%s2309_s7 + $0x10] sm:$0xff] }
 0x6e0   :  { %v1806_v54 = vpop.f32.mrf.mxu1 }
 0x6e2   :  { %v686_v55 = vpop.f32.mrf.mxu1 }
 0x6e3   :  { %1809 = vmatprep.mubr.msk.f32.mxu1 %vm214_vm1, %v686_v55  ;;  %v1496_v55 = vld [vmem:[%s2311_s9 + $0x38] sm:$0xff] }
 0x6e4   :  { %1810 = vmatmul.mubr.msk.f32.vlgmr.msra.gmra.mxu1 %vm214_vm1, %v1806_v54  ;;  %v885_v22 = vpop.xlane.xlu0 %884  ;;  %v1395_v54 = vld [vmem:[%s2309_s7] sm:$0xff] }
 0x6e5   :  { %1917 = vrcp.f32 %v885_v22  ;;  %1820 = vmatpush3.msra.mxu1 %v896_v41  ;;  %v1495_v22 = vld [vmem:[%s2311_s9 + $0x30] sm:$0xff] }
 0x6e8   :  { %v894_v56 = vpop.permute.xlu0 %893 }
 0x6e9   :  { %1821 = vmatprep.subr.mxu1 %v894_v56 }
 0x6ea   :  { %1822 = vmatpush3.msra.mxu1 %v894_v56  ;;  %v1494_v56 = vld [vmem:[%s2311_s9 + $0x28] sm:$0xff] }
 0x6eb   :  { %1826 = vmatprep.subr.mxu1 %v199_v62 }
 0x6f2   :  { %v1918_v59 = vpop.eup %1917 }
 0x6f3   :  { %v891_v60 = vmul.f32 %v1918_v59, %v1914_v45 }
 0x6f5   :  { %1823 = vmatprep.mubr.msk.f32.mxu1 %vm300_vm4, %v891_v60 }
 0x6f6   :  { %1824 = vmatmul.mubr.msk.f32.vlgmr.msra.gmra.mxu1 %vm300_vm4, %v892_v61 }
 0x6f7   :  { %1827 = vmatpush3.msra.mxu1 %v199_v62 }
 0x764   :  { %v1161_v63 = vpop.xlane.xlu0 %1160 }
 0x765   :  { %v1163_v0 = vsub.f32 %v1155_v48, %v1161_v63 }
 0x766   :  { %v1158_v1 = vpop.xlane.xlu1 %1157 }
 0x767   :  { %v1166_v3 = vmul.f32 1.442695, %v1163_v0  ;;  %v1162_v4 = vsub.f32 %v1154_v51, %v1158_v1 }
 0x769   :  { %1919 = vpow2.f32 %v1166_v3  ;;  %v1164_v6 = vmul.f32 1.442695, %v1162_v4  ;;  %v1687_v3 = vld [vmem:[%s2307_s5] ss:$0 sm:$0xff] }
 0x76b   :  { %1921 = vpow2.f32 %v1164_v6 }
 0x776   :  { %v1920_v7 = vpop.eup %1919 }
 0x777   :  { %v1171_v9 = vsel %vm300_vm4, %v1920_v7, 0.0 }
 0x778   :  { %v1922_v11 = vpop.eup %1921  ;;  %1172 = vadd.xlane.f32.xlu0 %v1171_v9 }
 0x779   :  { %v1168_v12 = vsel %vm300_vm4, %v1922_v11, 0.0 }
 0x77a   :  { %1169 = vadd.xlane.f32.xlu1 %v1168_v12 }
 0x78b   :  { %1180 = vrot.lane.b32.xlu1 %v2093_v8, %s1992_s22 }
 0x78e   :  { %1178 = vrot.lane.b32.xlu0 %v2095_v10, %s1992_s22 }
 0x7a4   :  { %v1811_v15 = vpop.f32.mrf.mxu1 }
 0x7a5   :  { %v777_v17 = vadd.f32 %v1811_v15, %v492_v14  ;;  %v1492_v15 = vld [vmem:[%s2311_s9 + $0x18] sm:$0xff] }
 0x7a6   :  { %v767_v18 = vpop.f32.mrf.mxu1 }
 0x7a7   :  { %v776_v19 = vadd.f32 %v767_v18, %v491_v16  ;;  %v1491_v16 = vld [vmem:[%s2311_s9 + $0x10] sm:$0xff]  ;;  %v1489_v18 = vld [vmem:[%s2311_s9] sm:$0xff] }
 0x7b6   :  { %v1825_v20 = vpop.f32.mrf.mxu1 }
 0x7b8   :  { %v971_v23 = vpop.f32.mrf.mxu1 }
 0x7b9   :  { %1828 = vmatprep.mubr.msk.f32.mxu1 %vm214_vm1, %v971_v23 }
 0x7ba   :  { %1829 = vmatmul.mubr.msk.f32.vlgmr.msra.gmra.mxu1 %vm214_vm1, %v1825_v20 }
 0x801   :  { %v1173_v8 = vpop.xlane.xlu0 %1172 }
 0x802   :  { %1923 = vrcp.f32 %v1173_v8 }
 0x803   :  { %v1170_v10 = vpop.xlane.xlu1 %1169 }
 0x804   :  { %1925 = vrcp.f32 %v1170_v10 }
 0x805   :  { %v1179_v25 = vpop.permute.xlu0 %1178 }
 0x807   :  { %v1181_v24 = vpop.permute.xlu1 %1180 }
 0x808   :  { %1838 = vmatprep.subr.mxu1 %v1181_v24 }
 0x809   :  { %1839 = vmatpush3.msra.mxu1 %v1181_v24 }
 0x80a   :  { %1840 = vmatprep.subr.mxu1 %v1179_v25 }
 0x80b   :  { %1841 = vmatpush3.msra.mxu1 %v1179_v25 }
 0x80c   :  { %1845 = vmatprep.subr.mxu1 %v200_v57 }
 0x80f   :  { %v1924_v58 = vpop.eup %1923 }
 0x810   :  { %v1177_v28 = vmul.f32 %v1924_v58, %v1920_v7 }
 0x811   :  { %v1926_v26 = vpop.eup %1925 }
 0x812   :  { %v1176_v27 = vmul.f32 %v1926_v26, %v1922_v11  ;;  %v1688_v11 = vld [vmem:[%s2308_s6] ss:$0 sm:$0xff] }
 0x814   :  { %1842 = vmatprep.mubr.msk.f32.mxu1 %vm300_vm4, %v1176_v27 }
 0x815   :  { %1843 = vmatmul.mubr.msk.f32.vlgmr.msra.gmra.mxu1 %vm300_vm4, %v1177_v28 }
 0x816   :  { %1846 = vmatpush3.msra.mxu1 %v200_v57  ;;  %v1692_v57 = vld [vmem:[%s2312_s10] ss:$0 sm:$0xff] }
 0x817   :  { %1861 = vmatprep.subr.mxu1 %v1496_v55 }
 0x87a   :  { %v1830_v29 = vpop.f32.mrf.mxu1 }
 0x87b   :  { %v1062_v30 = vadd.f32 %v1830_v29, %v777_v17  ;;  %v1490_v17 = vld [vmem:[%s2311_s9 + $0x8] sm:$0xff] }
 0x87c   :  { %v1052_v31 = vpop.f32.mrf.mxu1 }
 0x87d   :  { %v1061_v35 = vadd.f32 %v1052_v31, %v776_v19  ;;  %v1689_v19 = vld [vmem:[%s2310_s8] ss:$0 sm:$0xff] }
 0x8d5   :  { %v1844_v32 = vpop.f32.mrf.mxu1 }
 0x8d7   :  { %v1256_v33 = vpop.f32.mrf.mxu1 }
 0x8d8   :  { %1847 = vmatprep.mubr.msk.f32.mxu1 %vm214_vm1, %v1256_v33 }
 0x8d9   :  { %1848 = vmatmul.mubr.msk.f32.vlgmr.msra.gmra.mxu1 %vm214_vm1, %v1844_v32 }
 0x8da   :  { %1862 = vmatpush3.msra.mxu1 %v1496_v55 }
 0x8db   :  { %1863 = vmatprep.subr.mxu1 %v1495_v22 }
 0x8dc   :  { %1864 = vmatpush3.msra.mxu1 %v1495_v22 }
 0x8dd   :  { %1865 = vmatprep.subr.mxu1 %v1494_v56 }
 0x8de   :  { %1866 = vmatpush3.msra.mxu1 %v1494_v56 }
 0x8df   :  { %1867 = vmatprep.subr.mxu1 %v1493_v21 }
 0x8e0   :  { %1868 = vmatpush3.msra.mxu1 %v1493_v21 }
 0x8e1   :  { %1869 = vmatprep.subr.mxu1 %v1492_v15 }
 0x8e2   :  { %1870 = vmatpush3.msra.mxu1 %v1492_v15 }
 0x8e3   :  { %1871 = vmatprep.subr.mxu1 %v1491_v16 }
 0x8e4   :  { %1872 = vmatpush3.msra.mxu1 %v1491_v16 }
 0x8e5   :  { %1873 = vmatprep.subr.mxu1 %v1490_v17 }
 0x8e6   :  { %1874 = vmatpush3.msra.mxu1 %v1490_v17 }
 0x8e7   :  { %1875 = vmatprep.subr.mxu1 %v1489_v18 }
 0x8e8   :  { %1876 = vmatpush3.msra.mxu1 %v1489_v18 }
 0x999   :  { %v1849_v34 = vpop.f32.mrf.mxu1 }
 0x99a   :  { %v1347_v36 = vadd.f32 %v1849_v34, %v1062_v30 }
 0x99b   :  { %v1337_v37 = vpop.f32.mrf.mxu1 }
 0x99c   :  { %v1346_v38 = vadd.f32 %v1337_v37, %v1061_v35  ;;  %v1349_v39 = vadd.f32 %v1347_v36, %v2086_v5 }
 0x99e   :  { %v1355_v40 = vsel %vm72_vm0, %v1349_v39, 0.0  ;;  %v1348_v41 = vadd.f32 %v1346_v38, %v2076_v2  ;;  %v1398_v2 = vld [vmem:[%s2309_s7 + $0x18] sm:$0xff] }
 0x99f   :  { %1356 = vadd.xlane.f32.xlu0 %v1355_v40  ;;  %1850 = vmatprep.subr.mxu0 %v1398_v2 }
 0x9a0   :  { %v1352_v42 = vsel %vm72_vm0, %v1348_v41, 0.0  ;;  %1851 = vmatpush3.msra.mxu0 %v1398_v2  ;;  %v1696_v2 = vld [vmem:[%s2314_s12] ss:$0 sm:$0xff] }
 0x9a1   :  { %1353 = vadd.xlane.f32.xlu1 %v1352_v42  ;;  %1852 = vmatprep.subr.mxu0 %v1397_v52 }
 0x9a2   :  { %1853 = vmatpush3.msra.mxu0 %v1397_v52 }
 0x9a3   :  { %1854 = vmatprep.subr.mxu0 %v1396_v53 }
 0x9a4   :  { %1855 = vmatpush3.msra.mxu0 %v1396_v53 }
 0x9a5   :  { %1856 = vmatprep.subr.mxu0 %v1395_v54 }
 0x9a6   :  { %1857 = vmatpush3.msra.mxu0 %v1395_v54 }
 0xa28   :  { %v1357_v43 = vpop.xlane.xlu0 %1356 }
 0xa29   :  { %v1360_v44 = vmul.f32 0.03125, %v1357_v43 }
 0xa2a   :  { %v1354_v45 = vpop.xlane.xlu1 %1353 }
 0xa2b   :  { %v1362_v46 = vsub.f32 %v1349_v39, %v1360_v44  ;;  %v1359_v47 = vmul.f32 0.03125, %v1354_v45 }
 0xa2d   :  { %v1361_v48 = vsub.f32 %v1348_v41, %v1359_v47  ;;  %v1364_v49 = vmul.f32 %v1362_v46, %v1362_v46 }
 0xa2f   :  { %v1368_v50 = vsel %vm72_vm0, %v1364_v49, 0.0  ;;  %v1363_v51 = vmul.f32 %v1361_v48, %v1361_v48 }
 0xa30   :  { %1369 = vadd.xlane.f32.xlu0 %v1368_v50  ;;  %v1695_v50 = vld [vmem:[%s2313_s11] ss:$0 sm:$0xff] }
 0xa31   :  { %v1365_v5 = vsel %vm72_vm0, %v1363_v51, 0.0 }
 0xa32   :  { %1366 = vadd.xlane.f32.xlu1 %v1365_v5 }
 0xab9   :  { %v1370_v59 = vpop.xlane.xlu0 %1369 }
 0xaba   :  { %v1372_v60 = vmul.f32 0.03125, %v1370_v59 }
 0xabb   :  { %v1367_v61 = vpop.xlane.xlu1 %1366 }
 0xabc   :  { %v1374_v62 = vadd.f32 1e-05, %v1372_v60  ;;  %v1371_v63 = vmul.f32 0.03125, %v1367_v61 }
 0xabe   :  { %1927 = vrsqrt.f32 %v1374_v62  ;;  %v1373_v0 = vadd.f32 1e-05, %v1371_v63 }
 0xac0   :  { %1929 = vrsqrt.f32 %v1373_v0 }
 0xacb   :  { %v1928_v1 = vpop.eup %1927 }
 0xacc   :  { %v1378_v4 = vmul.f32 %v1928_v1, %v1362_v46 }
 0xacd   :  { %v1930_v6 = vpop.eup %1929 }
 0xace   :  { %v1377_v7 = vmul.f32 %v1930_v6, %v1361_v48  ;;  %v1386_v9 = vmul.f32 %v1687_v3, %v1378_v4 }
 0xad0   :  { %v1385_v12 = vmul.f32 %v1687_v3, %v1377_v7  ;;  %v1394_v14 = vadd.f32 %v1688_v11, %v1386_v9 }
 0xad2   :  { %v1393_v13 = vadd.f32 %v1688_v11, %v1385_v12 }
 0xad4   :  { %1858 = vmatprep.mubr.msk.f32.mxu0 %vm72_vm0, %v1393_v13 }
 0xad5   :  { %1859 = vmatmul.mubr.msk.f32.vlgmr.msra.gmra.mxu0 %vm72_vm0, %v1394_v14 }
 0xb95   :  { %v1860_v20 = vpop.f32.mrf.mxu0 }
 0xb96   :  { %v1484_v23 = vadd.f32 %v1860_v20, %v1689_v19 }
 0xb97   :  { %v1478_v8 = vpop.f32.mrf.mxu0 }
 0xb98   :  { %v1479_v10 = vadd.f32 %v1689_v19, %v1478_v8  ;;  %v1488_v25 = vmax.f32 %v1484_v23, 0.0 }
 0xb9a   :  { %v1487_v24 = vmax.f32 %v1479_v10, 0.0 }
 0xb9c   :  { %1877 = vmatprep.mubr.msk.f32.mxu1 %vm1504_vm5, %v1487_v24 }
 0xb9d   :  { %1878 = vmatmul.mubr.msk.f32.vlgmr.msra.gmra.mxu1 %vm1504_vm5, %v1488_v25 }
 0xc5d   :  { %v1879_v58 = vpop.f32.mrf.mxu1 }
 0xc5e   :  { %v1583_v26 = vadd.f32 %v1879_v58, %v1692_v57 }
 0xc5f   :  { %v1577_v27 = vpop.f32.mrf.mxu1 }
 0xc60   :  { %v1578_v28 = vadd.f32 %v1692_v57, %v1577_v27  ;;  %v1587_v29 = vadd.f32 %v1583_v26, %v1394_v14 }
 0xc62   :  { %v1593_v30 = vsel %vm72_vm0, %v1587_v29, 0.0  ;;  %v1586_v31 = vadd.f32 %v1578_v28, %v1393_v13 }
 0xc63   :  { %1594 = vadd.xlane.f32.xlu0 %v1593_v30 }
 0xc64   :  { %v1590_v32 = vsel %vm72_vm0, %v1586_v31, 0.0 }
 0xc65   :  { %1591 = vadd.xlane.f32.xlu1 %v1590_v32 }
 0xcec   :  { %v1595_v33 = vpop.xlane.xlu0 %1594 }
 0xced   :  { %v1597_v34 = vmul.f32 0.03125, %v1595_v33 }
 0xcee   :  { %v1592_v35 = vpop.xlane.xlu1 %1591 }
 0xcef   :  { %v1599_v36 = vsub.f32 %v1587_v29, %v1597_v34  ;;  %v1596_v37 = vmul.f32 0.03125, %v1592_v35 }
 0xcf1   :  { %v1598_v38 = vsub.f32 %v1586_v31, %v1596_v37  ;;  %v1601_v39 = vmul.f32 %v1599_v36, %v1599_v36 }
 0xcf3   :  { %v1605_v40 = vsel %vm72_vm0, %v1601_v39, 0.0  ;;  %v1600_v41 = vmul.f32 %v1598_v38, %v1598_v38 }
 0xcf4   :  { %1606 = vadd.xlane.f32.xlu0 %v1605_v40 }
 0xcf5   :  { %v1602_v42 = vsel %vm72_vm0, %v1600_v41, 0.0 }
 0xcf6   :  { %1603 = vadd.xlane.f32.xlu1 %v1602_v42 }
 0xd7d   :  { %v1607_v43 = vpop.xlane.xlu0 %1606 }
 0xd7e   :  { %v1609_v44 = vmul.f32 0.03125, %v1607_v43 }
 0xd7f   :  { %v1604_v45 = vpop.xlane.xlu1 %1603 }
 0xd80   :  { %v1611_v46 = vadd.f32 1e-05, %v1609_v44  ;;  %v1608_v47 = vmul.f32 0.03125, %v1604_v45 }
 0xd82   :  { %1931 = vrsqrt.f32 %v1611_v46  ;;  %v1610_v48 = vadd.f32 1e-05, %v1608_v47 }
 0xd84   :  { %1933 = vrsqrt.f32 %v1610_v48 }
 0xd8f   :  { %v1932_v49 = vpop.eup %1931 }
 0xd90   :  { %v1615_v51 = vmul.f32 %v1932_v49, %v1599_v36 }
 0xd91   :  { %v1934_v5 = vpop.eup %1933 }
 0xd92   :  { %v1614_v52 = vmul.f32 %v1934_v5, %v1598_v38  ;;  %v1623_v53 = vmul.f32 %v1695_v50, %v1615_v51 }
 0xd94   :  { %v1622_v54 = vmul.f32 %v1695_v50, %v1614_v52  ;;  %v1631_v55 = vadd.f32 %v1696_v2, %v1623_v53 }
 0xd96   :  { %v1630_v22 = vadd.f32 %v1696_v2, %v1622_v54  ;;  %1633 = vst.msk [vmem:[#allocation5 + $0x8] sm:$0xff] %vm72_vm0, %v1631_v55 }
 0xd98   :  { %1632 = vst.msk [vmem:[#allocation5] sm:$0xff] %vm72_vm0, %v1630_v22 }
 0xd99   :  { %1966 = shalt.err (!%p1963_p9)
}
 0xd9a   :  { %1645 = dma.vmem_to_hbm [thread:$0]  %s1640_s19, 256, %s2315_s13, [#allocation4], %s1980_s28, %s1980_s28, %s1981_s29  }
 0xd9b   :  { %1977 = dma.done.wait [#allocation4], 256  }
 0xd9c   :  { %1978 = vsyncadd [#allocation4], 4294967040 }
 0xd9d   :  { %1649 = vsyncpa [#allocation3], 1 }
 0xd9e   :  { %1650 = vsyncpa [#allocation4], 1 }

</bundles_post_ra>
